<compile_context>
chip_gen: v7x
topology: tpu7x:2x2x1
jax: 0.10.0
libtpu: 0.0.40
codegen_flags: <defaults>
</compile_context>

<pallas_src>
import functools

import jax
import jax.numpy as jnp
import numpy as np
from jax.experimental import pallas as pl
from jax.experimental.pallas import tpu as pltpu


# ------------------------------- kernel -------------------------------------
def _rec_softmax_kernel(x_ref, o_ref):
    """x_ref: (T, NB, V) logits block; o_ref: (NB, T, V) softmax-prob block.

    Row-wise softmax over V with the (T, N) transpose realized as static
    per-step stores into the box-major output block.
    """
    t_steps = x_ref.shape[0]
    for t in range(t_steps):                        # static unroll, T is small
        x = x_ref[t].astype(jnp.float32)            # (NB, V) full-vreg rows
        m = jnp.max(x, axis=-1, keepdims=True)      # lane reduce (XLU)
        e = jnp.exp(x - m)                          # EUP
        s = jnp.sum(e, axis=-1, keepdims=True)
        p = e * pl.reciprocal(s, approx=False)      # per-row recip + VPU mul
        o_ref[:, t, :] = p.astype(o_ref.dtype)      # transposed (static) store


# --------------------------- pallas wrapper ----------------------------------
def _choose_block_rows(n, t, v, itemsize, target_bytes=2 << 20):
    """Rows of the box axis per grid step (~2 MiB of input per step)."""
    bytes_per_row = max(1, t * v * itemsize)
    nb = max(1, target_bytes // bytes_per_row)
    if nb >= n:
        return n                                    # whole box axis in one block
    return max(8, int(nb // 8) * 8)                 # sublane-aligned tile


@functools.partial(jax.jit, static_argnames=("out_dtype",))
def word_probs_from_logits(x, out_dtype=jnp.float32):
    """(T, N_total, V) logits -> (N_total, T, V) softmax probs, one launch."""
    t, n, v = x.shape

    # Lane-dense vocabulary: pad V to a multiple of 128 with a very negative
    # constant so stores are unmasked; exp(pad) == 0 keeps softmax exact.
    vp = int(np.ceil(v / 128) * 128) if v % 128 != 0 else v
    if vp != v:
        x = jnp.pad(x, ((0, 0), (0, 0), (0, vp - v)), constant_values=-1e30)

    nb = _choose_block_rows(n, t, vp, jnp.dtype(x.dtype).itemsize)
    grid = (pl.cdiv(n, nb),)

    out = pl.pallas_call(
        _rec_softmax_kernel,
        grid=grid,
        in_specs=[pl.BlockSpec((t, nb, vp), lambda i: (0, i, 0))],   # seq-major read
        out_specs=pl.BlockSpec((nb, t, vp), lambda i: (i, 0, 0)),    # box-major write
        out_shape=jax.ShapeDtypeStruct((n, t, vp), out_dtype),
        compiler_params=pltpu.CompilerParams(
            dimension_semantics=("parallel",),       # shard box tiles across TCs
            vmem_limit_bytes=32 * 1024 * 1024,
        ),
    )(x)

    if vp != v:
        out = out[:, :, :v]
    return out


# ------------------------------ module glue ----------------------------------
def rrpn_rec_processor(x, boxes):
    """Forward of RRPNRecProcessor.

    x:     (T, N_total, V) word logits (sequence-major, like the PyTorch module).
    boxes: list (one per image) of dicts with at least a 'labels' field; the
           number of boxes per image is len(labels).
    Returns one result per image carrying the copied fields plus 'word_probs'.
    """
    word_probs = word_probs_from_logits(x)                       # (N_total, T, V)

    # Mirrors the reference's (unused downstream) label concatenation.
    _labels = jnp.concatenate([b["labels"] for b in boxes])
    boxes_per_image = [int(b["labels"].shape[0]) for b in boxes]

    results = []
    start = 0
    for box, nb in zip(boxes, boxes_per_image):
        prob = word_probs[start:start + nb]                      # split(dim=0)
        start += nb
        # TODO(synk): RBoxList(mode='xywha') / BoxList field bookkeeping has no
        # Pallas equivalent; results are plain dicts copying the fields.
        res = dict(box)
        res["word_probs"] = prob
        results.append(res)
    return results


# --------------------------------- main ---------------------------------------
if __name__ == "__main__":
    key = jax.random.PRNGKey(0)
    kx, _ = jax.random.split(key)

    T = 8                      # decode steps (small stand-in for max_step=35)
    V = 128                    # recognition vocabulary (lane-dense)
    boxes_per_image = [2, 2]
    n_total = sum(boxes_per_image)

    # (T, N_total, V) sequence-major logits, as the PyTorch module expects.
    x = jax.random.normal(kx, (T, n_total, V), jnp.float32)

    # Minimal stand-ins for the per-image BoxLists (only fields the forward touches).
    boxes = [
        {"bbox": jnp.zeros((boxes_per_image[0], 5), jnp.float32),
         "size": (640, 480),
         "labels": jnp.ones((boxes_per_image[0],), jnp.int32)},
        {"bbox": jnp.zeros((boxes_per_image[1], 5), jnp.float32),
         "size": (640, 480),
         "labels": jnp.ones((boxes_per_image[1],), jnp.int32)},
    ]

    results = rrpn_rec_processor(x, boxes)

    # Correctness check against plain-JAX reference.
    ref = jax.nn.softmax(jnp.transpose(x, (1, 0, 2)), axis=-1)
    start = 0
    for r, nb in zip(results, boxes_per_image):
        wp = jax.block_until_ready(r["word_probs"])
        assert wp.shape == (nb, T, V)
        np.testing.assert_allclose(np.asarray(wp),
                                   np.asarray(ref[start:start + nb]),
                                   atol=1e-5, rtol=1e-5)
        assert np.allclose(np.asarray(jnp.sum(wp, axis=-1)), 1.0, atol=1e-4)
        start += nb

    print("KERNEL_OK")
</pallas_src>

<mosaic_0001>
module attributes {stable_mosaic.version = 11 : i64} {
  func.func @_rec_softmax_kernel(%arg0: i32, %arg1: memref<8x4x128xf32, #tpu.memory_space<vmem>>, %arg2: memref<4x8x128xf32, #tpu.memory_space<vmem>>) attributes {dimension_semantics = [#tpu.dimension_semantics<parallel>], iteration_bounds = array<i64: 1>, scalar_prefetch = 0 : i64, scratch_operands = 0 : i64, tpu.core_type = #tpu.core_type<tc>, window_params = [{transform_indices = @transform_0, window_bounds = array<i64: 8, 4, 128>}, {transform_indices = @transform_1, window_bounds = array<i64: 4, 8, 128>}]} {
    %c0 = arith.constant 0 : index
    %c0_0 = arith.constant 0 : index
    %c0_1 = arith.constant 0 : index
    %0 = vector.load %arg1[%c0, %c0_0, %c0_1] : memref<8x4x128xf32, #tpu.memory_space<vmem>>, vector<1x4x128xf32>
    %1 = vector.shape_cast %0 : vector<1x4x128xf32> to vector<4x128xf32>
    %cst = arith.constant dense<0xFF800000> : vector<4xf32>
    %2 = vector.multi_reduction <maximumf>, %1, %cst [1] : vector<4x128xf32> to vector<4xf32>
    %3 = vector.shape_cast %2 : vector<4xf32> to vector<4x1xf32>
    %4 = vector.broadcast %3 : vector<4x1xf32> to vector<4x128xf32>
    %5 = arith.subf %1, %4 : vector<4x128xf32>
    %6 = math.exp %5 : vector<4x128xf32>
    %cst_2 = arith.constant dense<0.000000e+00> : vector<4xf32>
    %7 = vector.multi_reduction <add>, %6, %cst_2 [1] : vector<4x128xf32> to vector<4xf32>
    %8 = vector.shape_cast %7 : vector<4xf32> to vector<4x1xf32>
    %9 = tpu.reciprocal %8 : vector<4x1xf32> -> vector<4x1xf32>
    %10 = vector.broadcast %9 : vector<4x1xf32> to vector<4x128xf32>
    %11 = arith.mulf %6, %10 : vector<4x128xf32>
    %c0_3 = arith.constant 0 : index
    %c0_4 = arith.constant 0 : index
    %c0_5 = arith.constant 0 : index
    %12 = vector.load %arg2[%c0_3, %c0_4, %c0_5] : memref<4x8x128xf32, #tpu.memory_space<vmem>>, vector<4x1x128xf32>
    %13 = vector.shape_cast %12 : vector<4x1x128xf32> to vector<4x128xf32>
    %14 = vector.shape_cast %11 : vector<4x128xf32> to vector<4x1x128xf32>
    tpu.vector_store %arg2[%c0_3, %c0_4, %c0_5], %14 {strides = array<i32>} : memref<4x8x128xf32, #tpu.memory_space<vmem>>, vector<4x1x128xf32>,
    %c1 = arith.constant 1 : index
    %c0_6 = arith.constant 0 : index
    %c0_7 = arith.constant 0 : index
    %15 = vector.load %arg1[%c1, %c0_6, %c0_7] : memref<8x4x128xf32, #tpu.memory_space<vmem>>, vector<1x4x128xf32>
    %16 = vector.shape_cast %15 : vector<1x4x128xf32> to vector<4x128xf32>
    %cst_8 = arith.constant dense<0xFF800000> : vector<4xf32>
    %17 = vector.multi_reduction <maximumf>, %16, %cst_8 [1] : vector<4x128xf32> to vector<4xf32>
    %18 = vector.shape_cast %17 : vector<4xf32> to vector<4x1xf32>
    %19 = vector.broadcast %18 : vector<4x1xf32> to vector<4x128xf32>
    %20 = arith.subf %16, %19 : vector<4x128xf32>
    %21 = math.exp %20 : vector<4x128xf32>
    %cst_9 = arith.constant dense<0.000000e+00> : vector<4xf32>
    %22 = vector.multi_reduction <add>, %21, %cst_9 [1] : vector<4x128xf32> to vector<4xf32>
    %23 = vector.shape_cast %22 : vector<4xf32> to vector<4x1xf32>
    %24 = tpu.reciprocal %23 : vector<4x1xf32> -> vector<4x1xf32>
    %25 = vector.broadcast %24 : vector<4x1xf32> to vector<4x128xf32>
    %26 = arith.mulf %21, %25 : vector<4x128xf32>
    %c0_10 = arith.constant 0 : index
    %c1_11 = arith.constant 1 : index
    %c0_12 = arith.constant 0 : index
    %27 = vector.load %arg2[%c0_10, %c1_11, %c0_12] : memref<4x8x128xf32, #tpu.memory_space<vmem>>, vector<4x1x128xf32>
    %28 = vector.shape_cast %27 : vector<4x1x128xf32> to vector<4x128xf32>
    %29 = vector.shape_cast %26 : vector<4x128xf32> to vector<4x1x128xf32>
    tpu.vector_store %arg2[%c0_10, %c1_11, %c0_12], %29 {strides = array<i32>} : memref<4x8x128xf32, #tpu.memory_space<vmem>>, vector<4x1x128xf32>,
    %c2 = arith.constant 2 : index
    %c0_13 = arith.constant 0 : index
    %c0_14 = arith.constant 0 : index
    %30 = vector.load %arg1[%c2, %c0_13, %c0_14] : memref<8x4x128xf32, #tpu.memory_space<vmem>>, vector<1x4x128xf32>
    %31 = vector.shape_cast %30 : vector<1x4x128xf32> to vector<4x128xf32>
    %cst_15 = arith.constant dense<0xFF800000> : vector<4xf32>
    %32 = vector.multi_reduction <maximumf>, %31, %cst_15 [1] : vector<4x128xf32> to vector<4xf32>
    %33 = vector.shape_cast %32 : vector<4xf32> to vector<4x1xf32>
    %34 = vector.broadcast %33 : vector<4x1xf32> to vector<4x128xf32>
    %35 = arith.subf %31, %34 : vector<4x128xf32>
    %36 = math.exp %35 : vector<4x128xf32>
    %cst_16 = arith.constant dense<0.000000e+00> : vector<4xf32>
    %37 = vector.multi_reduction <add>, %36, %cst_16 [1] : vector<4x128xf32> to vector<4xf32>
    %38 = vector.shape_cast %37 : vector<4xf32> to vector<4x1xf32>
    %39 = tpu.reciprocal %38 : vector<4x1xf32> -> vector<4x1xf32>
    %40 = vector.broadcast %39 : vector<4x1xf32> to vector<4x128xf32>
    %41 = arith.mulf %36, %40 : vector<4x128xf32>
    %c0_17 = arith.constant 0 : index
    %c2_18 = arith.constant 2 : index
    %c0_19 = arith.constant 0 : index
    %42 = vector.load %arg2[%c0_17, %c2_18, %c0_19] : memref<4x8x128xf32, #tpu.memory_space<vmem>>, vector<4x1x128xf32>
    %43 = vector.shape_cast %42 : vector<4x1x128xf32> to vector<4x128xf32>
    %44 = vector.shape_cast %41 : vector<4x128xf32> to vector<4x1x128xf32>
    tpu.vector_store %arg2[%c0_17, %c2_18, %c0_19], %44 {strides = array<i32>} : memref<4x8x128xf32, #tpu.memory_space<vmem>>, vector<4x1x128xf32>,
    %c3 = arith.constant 3 : index
    %c0_20 = arith.constant 0 : index
    %c0_21 = arith.constant 0 : index
    %45 = vector.load %arg1[%c3, %c0_20, %c0_21] : memref<8x4x128xf32, #tpu.memory_space<vmem>>, vector<1x4x128xf32>
    %46 = vector.shape_cast %45 : vector<1x4x128xf32> to vector<4x128xf32>
    %cst_22 = arith.constant dense<0xFF800000> : vector<4xf32>
    %47 = vector.multi_reduction <maximumf>, %46, %cst_22 [1] : vector<4x128xf32> to vector<4xf32>
    %48 = vector.shape_cast %47 : vector<4xf32> to vector<4x1xf32>
    %49 = vector.broadcast %48 : vector<4x1xf32> to vector<4x128xf32>
    %50 = arith.subf %46, %49 : vector<4x128xf32>
    %51 = math.exp %50 : vector<4x128xf32>
    %cst_23 = arith.constant dense<0.000000e+00> : vector<4xf32>
    %52 = vector.multi_reduction <add>, %51, %cst_23 [1] : vector<4x128xf32> to vector<4xf32>
    %53 = vector.shape_cast %52 : vector<4xf32> to vector<4x1xf32>
    %54 = tpu.reciprocal %53 : vector<4x1xf32> -> vector<4x1xf32>
    %55 = vector.broadcast %54 : vector<4x1xf32> to vector<4x128xf32>
    %56 = arith.mulf %51, %55 : vector<4x128xf32>
    %c0_24 = arith.constant 0 : index
    %c3_25 = arith.constant 3 : index
    %c0_26 = arith.constant 0 : index
    %57 = vector.load %arg2[%c0_24, %c3_25, %c0_26] : memref<4x8x128xf32, #tpu.memory_space<vmem>>, vector<4x1x128xf32>
    %58 = vector.shape_cast %57 : vector<4x1x128xf32> to vector<4x128xf32>
    %59 = vector.shape_cast %56 : vector<4x128xf32> to vector<4x1x128xf32>
    tpu.vector_store %arg2[%c0_24, %c3_25, %c0_26], %59 {strides = array<i32>} : memref<4x8x128xf32, #tpu.memory_space<vmem>>, vector<4x1x128xf32>,
    %c4 = arith.constant 4 : index
    %c0_27 = arith.constant 0 : index
    %c0_28 = arith.constant 0 : index
    %60 = vector.load %arg1[%c4, %c0_27, %c0_28] : memref<8x4x128xf32, #tpu.memory_space<vmem>>, vector<1x4x128xf32>
    %61 = vector.shape_cast %60 : vector<1x4x128xf32> to vector<4x128xf32>
    %cst_29 = arith.constant dense<0xFF800000> : vector<4xf32>
    %62 = vector.multi_reduction <maximumf>, %61, %cst_29 [1] : vector<4x128xf32> to vector<4xf32>
    %63 = vector.shape_cast %62 : vector<4xf32> to vector<4x1xf32>
    %64 = vector.broadcast %63 : vector<4x1xf32> to vector<4x128xf32>
    %65 = arith.subf %61, %64 : vector<4x128xf32>
    %66 = math.exp %65 : vector<4x128xf32>
    %cst_30 = arith.constant dense<0.000000e+00> : vector<4xf32>
    %67 = vector.multi_reduction <add>, %66, %cst_30 [1] : vector<4x128xf32> to vector<4xf32>
    %68 = vector.shape_cast %67 : vector<4xf32> to vector<4x1xf32>
    %69 = tpu.reciprocal %68 : vector<4x1xf32> -> vector<4x1xf32>
    %70 = vector.broadcast %69 : vector<4x1xf32> to vector<4x128xf32>
    %71 = arith.mulf %66, %70 : vector<4x128xf32>
    %c0_31 = arith.constant 0 : index
    %c4_32 = arith.constant 4 : index
    %c0_33 = arith.constant 0 : index
    %72 = vector.load %arg2[%c0_31, %c4_32, %c0_33] : memref<4x8x128xf32, #tpu.memory_space<vmem>>, vector<4x1x128xf32>
    %73 = vector.shape_cast %72 : vector<4x1x128xf32> to vector<4x128xf32>
    %74 = vector.shape_cast %71 : vector<4x128xf32> to vector<4x1x128xf32>
    tpu.vector_store %arg2[%c0_31, %c4_32, %c0_33], %74 {strides = array<i32>} : memref<4x8x128xf32, #tpu.memory_space<vmem>>, vector<4x1x128xf32>,
    %c5 = arith.constant 5 : index
    %c0_34 = arith.constant 0 : index
    %c0_35 = arith.constant 0 : index
    %75 = vector.load %arg1[%c5, %c0_34, %c0_35] : memref<8x4x128xf32, #tpu.memory_space<vmem>>, vector<1x4x128xf32>
    %76 = vector.shape_cast %75 : vector<1x4x128xf32> to vector<4x128xf32>
    %cst_36 = arith.constant dense<0xFF800000> : vector<4xf32>
    %77 = vector.multi_reduction <maximumf>, %76, %cst_36 [1] : vector<4x128xf32> to vector<4xf32>
    %78 = vector.shape_cast %77 : vector<4xf32> to vector<4x1xf32>
    %79 = vector.broadcast %78 : vector<4x1xf32> to vector<4x128xf32>
    %80 = arith.subf %76, %79 : vector<4x128xf32>
    %81 = math.exp %80 : vector<4x128xf32>
    %cst_37 = arith.constant dense<0.000000e+00> : vector<4xf32>
    %82 = vector.multi_reduction <add>, %81, %cst_37 [1] : vector<4x128xf32> to vector<4xf32>
    %83 = vector.shape_cast %82 : vector<4xf32> to vector<4x1xf32>
    %84 = tpu.reciprocal %83 : vector<4x1xf32> -> vector<4x1xf32>
    %85 = vector.broadcast %84 : vector<4x1xf32> to vector<4x128xf32>
    %86 = arith.mulf %81, %85 : vector<4x128xf32>
    %c0_38 = arith.constant 0 : index
    %c5_39 = arith.constant 5 : index
    %c0_40 = arith.constant 0 : index
    %87 = vector.load %arg2[%c0_38, %c5_39, %c0_40] : memref<4x8x128xf32, #tpu.memory_space<vmem>>, vector<4x1x128xf32>
    %88 = vector.shape_cast %87 : vector<4x1x128xf32> to vector<4x128xf32>
    %89 = vector.shape_cast %86 : vector<4x128xf32> to vector<4x1x128xf32>
    tpu.vector_store %arg2[%c0_38, %c5_39, %c0_40], %89 {strides = array<i32>} : memref<4x8x128xf32, #tpu.memory_space<vmem>>, vector<4x1x128xf32>,
    %c6 = arith.constant 6 : index
    %c0_41 = arith.constant 0 : index
    %c0_42 = arith.constant 0 : index
    %90 = vector.load %arg1[%c6, %c0_41, %c0_42] : memref<8x4x128xf32, #tpu.memory_space<vmem>>, vector<1x4x128xf32>
    %91 = vector.shape_cast %90 : vector<1x4x128xf32> to vector<4x128xf32>
    %cst_43 = arith.constant dense<0xFF800000> : vector<4xf32>
    %92 = vector.multi_reduction <maximumf>, %91, %cst_43 [1] : vector<4x128xf32> to vector<4xf32>
    %93 = vector.shape_cast %92 : vector<4xf32> to vector<4x1xf32>
    %94 = vector.broadcast %93 : vector<4x1xf32> to vector<4x128xf32>
    %95 = arith.subf %91, %94 : vector<4x128xf32>
    %96 = math.exp %95 : vector<4x128xf32>
    %cst_44 = arith.constant dense<0.000000e+00> : vector<4xf32>
    %97 = vector.multi_reduction <add>, %96, %cst_44 [1] : vector<4x128xf32> to vector<4xf32>
    %98 = vector.shape_cast %97 : vector<4xf32> to vector<4x1xf32>
    %99 = tpu.reciprocal %98 : vector<4x1xf32> -> vector<4x1xf32>
    %100 = vector.broadcast %99 : vector<4x1xf32> to vector<4x128xf32>
    %101 = arith.mulf %96, %100 : vector<4x128xf32>
    %c0_45 = arith.constant 0 : index
    %c6_46 = arith.constant 6 : index
    %c0_47 = arith.constant 0 : index
    %102 = vector.load %arg2[%c0_45, %c6_46, %c0_47] : memref<4x8x128xf32, #tpu.memory_space<vmem>>, vector<4x1x128xf32>
    %103 = vector.shape_cast %102 : vector<4x1x128xf32> to vector<4x128xf32>
    %104 = vector.shape_cast %101 : vector<4x128xf32> to vector<4x1x128xf32>
    tpu.vector_store %arg2[%c0_45, %c6_46, %c0_47], %104 {strides = array<i32>} : memref<4x8x128xf32, #tpu.memory_space<vmem>>, vector<4x1x128xf32>,
    %c7 = arith.constant 7 : index
    %c0_48 = arith.constant 0 : index
    %c0_49 = arith.constant 0 : index
    %105 = vector.load %arg1[%c7, %c0_48, %c0_49] : memref<8x4x128xf32, #tpu.memory_space<vmem>>, vector<1x4x128xf32>
    %106 = vector.shape_cast %105 : vector<1x4x128xf32> to vector<4x128xf32>
    %cst_50 = arith.constant dense<0xFF800000> : vector<4xf32>
    %107 = vector.multi_reduction <maximumf>, %106, %cst_50 [1] : vector<4x128xf32> to vector<4xf32>
    %108 = vector.shape_cast %107 : vector<4xf32> to vector<4x1xf32>
    %109 = vector.broadcast %108 : vector<4x1xf32> to vector<4x128xf32>
    %110 = arith.subf %106, %109 : vector<4x128xf32>
    %111 = math.exp %110 : vector<4x128xf32>
    %cst_51 = arith.constant dense<0.000000e+00> : vector<4xf32>
    %112 = vector.multi_reduction <add>, %111, %cst_51 [1] : vector<4x128xf32> to vector<4xf32>
    %113 = vector.shape_cast %112 : vector<4xf32> to vector<4x1xf32>
    %114 = tpu.reciprocal %113 : vector<4x1xf32> -> vector<4x1xf32>
    %115 = vector.broadcast %114 : vector<4x1xf32> to vector<4x128xf32>
    %116 = arith.mulf %111, %115 : vector<4x128xf32>
    %c0_52 = arith.constant 0 : index
    %c7_53 = arith.constant 7 : index
    %c0_54 = arith.constant 0 : index
    %117 = vector.load %arg2[%c0_52, %c7_53, %c0_54] : memref<4x8x128xf32, #tpu.memory_space<vmem>>, vector<4x1x128xf32>
    %118 = vector.shape_cast %117 : vector<4x1x128xf32> to vector<4x128xf32>
    %119 = vector.shape_cast %116 : vector<4x128xf32> to vector<4x1x128xf32>
    tpu.vector_store %arg2[%c0_52, %c7_53, %c0_54], %119 {strides = array<i32>} : memref<4x8x128xf32, #tpu.memory_space<vmem>>, vector<4x1x128xf32>,
    return
  }
  func.func @transform_0(%arg0: i32) -> (i32, i32, i32) {
    %c0_i32 = arith.constant 0 : i32
    %c0_i32_0 = arith.constant 0 : i32
    %c0_i32_1 = arith.constant 0 : i32
    return %c0_i32, %arg0, %c0_i32_0 : i32, i32, i32
  }
  func.func @transform_1(%arg0: i32) -> (i32, i32, i32) {
    %c0_i32 = arith.constant 0 : i32
    %c0_i32_0 = arith.constant 0 : i32
    %c0_i32_1 = arith.constant 0 : i32
    return %arg0, %c0_i32, %c0_i32_0 : i32, i32, i32
  }
}

</mosaic_0001>

<bundles_post_ra>
// kernel: word_probs_from_logits.1
= control target key start
LH: loop header
LB: loop body
LE: loop exit
PB: predicated region body
PF: predicated region fallthrough
CT: control target
= control target key end

     0   :  { %6 = vsyncpa [#allocation3], 0  ;;  %s606_s0 = inlined_call_operand.hbm [shape: f32[8,4,128], index: 0, kind: input, shape index: {}]   ;;  %s607_s1 = inlined_call_operand.hbm [shape: f32[4,8,128], index: 1, kind: output, shape index: {}]  }
   0x1   :  { %7 = vsyncpa [#allocation4], 0  ;;  %s511_s6 = smov [#allocation2]   ;;  %s463_s10 = scalar_lea.hbm %s606_s0, 512 }
   0x2   :  { %s13_s7 = sshll.u32 %s511_s6, 4  ;;  %p464_p0 = scmp.ne.s32.totalorder %s606_s0, %s463_s10  ;;  %s14_s7 = int_to_ptr.vmem [resolvable:$true] %s13_s7 }
   0x3   :  { %p467_p1 = scmp.lt.u32.totalorder %s463_s10, %s606_s0 }
   0x5   :  { %p469_p2 = pnand %p467_p1, %p464_p0 }
   0x7   :  { %472 = shalt.err (!%p469_p2)
}
   0x8   :  { %s473_s15 = scalar_lea.vmem %s14_s7, 512  ;;  %p478_p4 = scmp.lt.s32.totalorder %s14_s7, %s14_s7 }
   0x9   :  { %p474_p3 = scmp.ne.s32.totalorder %s14_s7, %s473_s15  ;;  %p479_p5 = scmp.lt.s32.totalorder %s473_s15, %s473_s15 }
   0xb   :  { %p480_p6 = por %p479_p5, %p478_p4 }
   0xd   :  { %p481_p7 = pnand %p480_p6, %p474_p3 }
   0xf   :  { %484 = shalt.err (!%p481_p7)
}
  0x10   :  { %s512_s16 = smov 64   ;;  %s513_s17 = smov 4  }
  0x11   :  { %19 = dma.hbm_to_vmem [thread:$0]  %s606_s0, 512, %s14_s7, [#allocation3], %s512_s16, %s512_s16, %s513_s17  }
  0x12   :  { %507 = dma.done.wait [#allocation3], 512  }
  0x13   :  { %508 = vsyncadd [#allocation3], 4294966784  ;;  %vm24_vm0 = vcmask 1043456   ;;  %v23_v0 = vld [vmem:[#allocation2] sm:$0xf]  ;;  %v40_v59 = vlaneseq  ;;  %s515_s0 = smov [#allocation5]  }
  0x14   :  { %v116_v1 = vld [vmem:[#allocation2 + $0x8] sm:$0xf]  ;;  %v70_v2 = vld [vmem:[#allocation2 + $0x4] sm:$0xf]  ;;  %v25_v3 = vsel %vm24_vm0, %v23_v0, -inf  ;;  %s396_s20 = sshll.u32 %s515_s0, 4  ;;  %s397_s20 = int_to_ptr.vmem [resolvable:$true] %s396_s20 }
  0x15   :  { %v117_v4 = vsel %vm24_vm0, %v116_v1, -inf  ;;  %v162_v5 = vld [vmem:[#allocation2 + $0xc] sm:$0xf]  ;;  %26 = vmax.xlane.f32.xlu0 %v25_v3  ;;  %v71_v6 = vsel %vm24_vm0, %v70_v2, -inf  ;;  %v208_v8 = vld [vmem:[#allocation2 + $0x10] sm:$0xf]  ;;  %p490_p9 = scmp.lt.s32.totalorder %s397_s20, %s397_s20 }
  0x16   :  { %118 = vmax.xlane.f32.xlu1 %v117_v4  ;;  %v163_v7 = vsel %vm24_vm0, %v162_v5, -inf  ;;  %v254_v9 = vld [vmem:[#allocation2 + $0x14] sm:$0xf]  ;;  %v209_v10 = vsel %vm24_vm0, %v208_v8, -inf  ;;  %v300_v12 = vld [vmem:[#allocation2 + $0x18] sm:$0xf] }
  0x17   :  { %v255_v11 = vsel %vm24_vm0, %v254_v9, -inf  ;;  %v346_v13 = vld [vmem:[#allocation2 + $0x1c] sm:$0xf]  ;;  %v301_v14 = vsel %vm24_vm0, %v300_v12, -inf  ;;  %v514_v57 = vmov 1966171168  }
  0x18   :  { %v347_v15 = vsel %vm24_vm0, %v346_v13, -inf  ;;  %v38_v58 = vunpack.c.l.s4 %v514_v57  ;;  %v41_v63 = vshrl.u32 %v40_v59, 7  ;;  %s485_s21 = scalar_lea.vmem %s397_s20, 512 }
  0x19   :  { %72 = vmax.xlane.f32.xlu0 %v71_v6  ;;  %p486_p8 = scmp.ne.s32.totalorder %s397_s20, %s485_s21  ;;  %p491_p10 = scmp.lt.s32.totalorder %s485_s21, %s485_s21 }
  0x1a   :  { %164 = vmax.xlane.f32.xlu1 %v163_v7  ;;  %v39_v62 = vunpack.c.0.s8 %v38_v58 }
  0x1b   :  { %p492_p11 = por %p491_p10, %p490_p9 }
  0x1d   :  { %210 = vmax.xlane.f32.xlu0 %v209_v10  ;;  %p493_p12 = pnand %p492_p11, %p486_p8 }
  0x1e   :  { %256 = vmax.xlane.f32.xlu1 %v255_v11 }
  0x21   :  { %302 = vmax.xlane.f32.xlu0 %v301_v14 }
  0x22   :  { %348 = vmax.xlane.f32.xlu1 %v347_v15 }
  0xa2   :  { %v27_v16 = vpop.xlane.xlu0 %26 }
  0xa3   :  { %v119_v17 = vpop.xlane.xlu1 %118  ;;  %v28_v18 = vsub.f32 %v23_v0, %v27_v16 }
  0xa4   :  { %v120_v19 = vsub.f32 %v116_v1, %v119_v17 }
  0xa5   :  { %v29_v20 = vmul.f32 1.442695, %v28_v18 }
  0xa6   :  { %v121_v21 = vmul.f32 1.442695, %v120_v19  ;;  %v73_v22 = vpop.xlane.xlu0 %72 }
  0xa7   :  { %v165_v23 = vpop.xlane.xlu1 %164  ;;  %431 = vpow2.f32 %v29_v20  ;;  %v74_v24 = vsub.f32 %v70_v2, %v73_v22  ;;  %v565_v2 = vsub.s32 %v39_v62, %v41_v63 }
  0xa8   :  { %v166_v25 = vsub.f32 %v162_v5, %v165_v23  ;;  %433 = vpow2.f32 %v121_v21 }
  0xa9   :  { %v75_v26 = vmul.f32 1.442695, %v74_v24 }
  0xaa   :  { %v167_v27 = vmul.f32 1.442695, %v166_v25  ;;  %v211_v28 = vpop.xlane.xlu0 %210 }
  0xab   :  { %v257_v29 = vpop.xlane.xlu1 %256  ;;  %435 = vpow2.f32 %v75_v26  ;;  %v212_v30 = vsub.f32 %v208_v8, %v211_v28 }
  0xac   :  { %v258_v31 = vsub.f32 %v254_v9, %v257_v29  ;;  %437 = vpow2.f32 %v167_v27 }
  0xad   :  { %v213_v32 = vmul.f32 1.442695, %v212_v30 }
  0xae   :  { %v259_v33 = vmul.f32 1.442695, %v258_v31  ;;  %v303_v34 = vpop.xlane.xlu0 %302 }
  0xaf   :  { %v349_v35 = vpop.xlane.xlu1 %348  ;;  %439 = vpow2.f32 %v213_v32  ;;  %v304_v36 = vsub.f32 %v300_v12, %v303_v34 }
  0xb0   :  { %v350_v37 = vsub.f32 %v346_v13, %v349_v35  ;;  %441 = vpow2.f32 %v259_v33 }
  0xb1   :  { %v432_v38 = vpop.eup %431  ;;  %v305_v39 = vmul.f32 1.442695, %v304_v36 }
  0xb2   :  { %v351_v40 = vmul.f32 1.442695, %v350_v37  ;;  %v434_v41 = vpop.eup %433  ;;  %v31_v42 = vsel %vm24_vm0, %v432_v38, 0.0 }
  0xb3   :  { %443 = vpow2.f32 %v305_v39  ;;  %32 = vadd.xlane.f32.xlu0 %v31_v42  ;;  %v123_v43 = vsel %vm24_vm0, %v434_v41, 0.0 }
  0xb4   :  { %445 = vpow2.f32 %v351_v40 }
  0xb5   :  { %v436_v44 = vpop.eup %435 }
  0xb6   :  { %v438_v45 = vpop.eup %437  ;;  %v77_v46 = vsel %vm24_vm0, %v436_v44, 0.0 }
  0xb7   :  { %124 = vadd.xlane.f32.xlu0 %v123_v43  ;;  %78 = vadd.xlane.f32.xlu1 %v77_v46  ;;  %v169_v47 = vsel %vm24_vm0, %v438_v45, 0.0 }
  0xb9   :  { %v440_v48 = vpop.eup %439 }
  0xba   :  { %v552_v49 = vpop.eup %441  ;;  %v215_v50 = vsel %vm24_vm0, %v440_v48, 0.0 }
  0xbb   :  { %170 = vadd.xlane.f32.xlu1 %v169_v47  ;;  %216 = vadd.xlane.f32.xlu0 %v215_v50  ;;  %v261_v51 = vsel %vm24_vm0, %v552_v49, 0.0 }
  0xbd   :  { %v557_v52 = vpop.eup %443 }
  0xbe   :  { %v559_v53 = vpop.eup %445  ;;  %v307_v54 = vsel %vm24_vm0, %v557_v52, 0.0 }
  0xbf   :  { %262 = vadd.xlane.f32.xlu1 %v261_v51  ;;  %308 = vadd.xlane.f32.xlu0 %v307_v54  ;;  %v353_v55 = vsel %vm24_vm0, %v559_v53, 0.0 }
  0xc3   :  { %354 = vadd.xlane.f32.xlu1 %v353_v55 }
 0x140   :  { %v33_v56 = vpop.xlane.xlu0 %32 }
 0x141   :  { %447 = vrcp.f32 %v33_v56 }
 0x144   :  { %v79_v60 = vpop.xlane.xlu1 %78  ;;  %v125_v61 = vpop.xlane.xlu0 %124 }
 0x145   :  { %449 = vrcp.f32 %v79_v60 }
 0x146   :  { %451 = vrcp.f32 %v125_v61 }
 0x148   :  { %v171_v0 = vpop.xlane.xlu1 %170  ;;  %v217_v1 = vpop.xlane.xlu0 %216 }
 0x149   :  { %453 = vrcp.f32 %v171_v0 }
 0x14a   :  { %455 = vrcp.f32 %v217_v1 }
 0x14b   :  { %v448_v3 = vpop.eup %447 }
 0x14c   :  { %v35_v4 = vmul.f32 %v448_v3, %v432_v38  ;;  %v263_v5 = vpop.xlane.xlu1 %262  ;;  %v309_v6 = vpop.xlane.xlu0 %308 }
 0x14d   :  { %457 = vrcp.f32 %v263_v5 }
 0x14e   :  { %v43_v7 = vrot.slane %v35_v4, %v565_v2  ;;  %459 = vrcp.f32 %v309_v6 }
 0x14f   :  { %v450_v8 = vpop.eup %449 }
 0x150   :  { %v452_v9 = vpop.eup %451  ;;  %v44_v10 = vcombine.high %v43_v7, %v43_v7  ;;  %v51_v11 = vrot.slane %v43_v7, %v565_v2  ;;  %408 = vst.sshfl [vmem:[#allocation5] sm:$0x1 pattern:$0x73625140] %v43_v7  ;;  %v81_v12 = vmul.f32 %v450_v8, %v436_v44  ;;  %v355_v13 = vpop.xlane.xlu1 %354 }
 0x151   :  { %v127_v14 = vmul.f32 %v452_v9, %v434_v41  ;;  %461 = vrcp.f32 %v355_v13 }
 0x152   :  { %v58_v15 = vrot.slane %v44_v10, %v565_v2  ;;  %v59_v16 = vcombine.high %v51_v11, %v51_v11  ;;  %409 = vst.sshfl [vmem:[#allocation5 + $0x8] sm:$0x1 pattern:$0x73625140] %v44_v10  ;;  %v89_v17 = vrot.slane %v81_v12, %v565_v2 }
 0x153   :  { %v454_v18 = vpop.eup %453  ;;  %v135_v19 = vrot.slane %v127_v14, %v565_v2 }
 0x154   :  { %v456_v20 = vpop.eup %455  ;;  %v60_v21 = vcombine.high %v58_v15, %v58_v15  ;;  %67 = vst [vmem:[#allocation5 + $0x10] sm:$0x1] %v59_v16  ;;  %v90_v22 = vcombine.high %v89_v17, %v89_v17  ;;  %v97_v23 = vrot.slane %v89_v17, %v565_v2  ;;  %410 = vst.sshfl [vmem:[#allocation5 + $0x1] sm:$0x1 pattern:$0x73625140] %v89_v17 }
 0x155   :  { %v173_v24 = vmul.f32 %v454_v18, %v438_v45  ;;  %v136_v25 = vcombine.high %v135_v19, %v135_v19  ;;  %v143_v26 = vrot.slane %v135_v19, %v565_v2  ;;  %412 = vst.sshfl [vmem:[#allocation5 + $0x2] sm:$0x1 pattern:$0x73625140] %v135_v19  ;;  %v219_v27 = vmul.f32 %v456_v20, %v440_v48 }
 0x156   :  { %68 = vst [vmem:[#allocation5 + $0x18] sm:$0x1] %v60_v21  ;;  %v104_v28 = vrot.slane %v90_v22, %v565_v2  ;;  %v105_v29 = vcombine.high %v97_v23, %v97_v23  ;;  %411 = vst.sshfl [vmem:[#allocation5 + $0x9] sm:$0x1 pattern:$0x73625140] %v90_v22 }
 0x157   :  { %v181_v30 = vrot.slane %v173_v24, %v565_v2  ;;  %v458_v31 = vpop.eup %457  ;;  %v150_v32 = vrot.slane %v136_v25, %v565_v2  ;;  %v151_v33 = vcombine.high %v143_v26, %v143_v26  ;;  %413 = vst.sshfl [vmem:[#allocation5 + $0xa] sm:$0x1 pattern:$0x73625140] %v136_v25  ;;  %v227_v34 = vrot.slane %v219_v27, %v565_v2 }
 0x158   :  { %v460_v35 = vpop.eup %459  ;;  %v106_v36 = vcombine.high %v104_v28, %v104_v28  ;;  %113 = vst [vmem:[#allocation5 + $0x11] sm:$0x1] %v105_v29  ;;  %v265_v39 = vmul.f32 %v458_v31, %v552_v49 }
 0x159   :  { %v182_v37 = vcombine.high %v181_v30, %v181_v30  ;;  %v189_v38 = vrot.slane %v181_v30, %v565_v2  ;;  %414 = vst.sshfl [vmem:[#allocation5 + $0x3] sm:$0x1 pattern:$0x73625140] %v181_v30  ;;  %v152_v40 = vcombine.high %v150_v32, %v150_v32  ;;  %159 = vst [vmem:[#allocation5 + $0x12] sm:$0x1] %v151_v33 }
 0x15a   :  { %v228_v41 = vcombine.high %v227_v34, %v227_v34  ;;  %v235_v42 = vrot.slane %v227_v34, %v565_v2  ;;  %416 = vst.sshfl [vmem:[#allocation5 + $0x4] sm:$0x1 pattern:$0x73625140] %v227_v34  ;;  %v311_v43 = vmul.f32 %v460_v35, %v557_v52  ;;  %114 = vst [vmem:[#allocation5 + $0x19] sm:$0x1] %v106_v36 }
 0x15b   :  { %v196_v44 = vrot.slane %v182_v37, %v565_v2  ;;  %v197_v45 = vcombine.high %v189_v38, %v189_v38  ;;  %415 = vst.sshfl [vmem:[#allocation5 + $0xb] sm:$0x1 pattern:$0x73625140] %v182_v37  ;;  %v273_v46 = vrot.slane %v265_v39, %v565_v2  ;;  %v462_v47 = vpop.eup %461  ;;  %160 = vst [vmem:[#allocation5 + $0x1a] sm:$0x1] %v152_v40 }
 0x15c   :  { %v242_v48 = vrot.slane %v228_v41, %v565_v2  ;;  %v243_v49 = vcombine.high %v235_v42, %v235_v42  ;;  %417 = vst.sshfl [vmem:[#allocation5 + $0xc] sm:$0x1 pattern:$0x73625140] %v228_v41  ;;  %v319_v50 = vrot.slane %v311_v43, %v565_v2  ;;  %v357_v55 = vmul.f32 %v462_v47, %v559_v53 }
 0x15d   :  { %v198_v51 = vcombine.high %v196_v44, %v196_v44  ;;  %205 = vst [vmem:[#allocation5 + $0x13] sm:$0x1] %v197_v45  ;;  %v274_v54 = vcombine.high %v273_v46, %v273_v46  ;;  %v281_v52 = vrot.slane %v273_v46, %v565_v2  ;;  %418 = vst.sshfl [vmem:[#allocation5 + $0x5] sm:$0x1 pattern:$0x73625140] %v273_v46 }
 0x15e   :  { %v244_v56 = vcombine.high %v242_v48, %v242_v48  ;;  %251 = vst [vmem:[#allocation5 + $0x14] sm:$0x1] %v243_v49  ;;  %v320_v57 = vcombine.high %v319_v50, %v319_v50  ;;  %v327_v58 = vrot.slane %v319_v50, %v565_v2  ;;  %420 = vst.sshfl [vmem:[#allocation5 + $0x6] sm:$0x1 pattern:$0x73625140] %v319_v50 }
 0x15f   :  { %206 = vst [vmem:[#allocation5 + $0x1b] sm:$0x1] %v198_v51  ;;  %v288_v59 = vrot.slane %v274_v54, %v565_v2  ;;  %v289_v60 = vcombine.high %v281_v52, %v281_v52  ;;  %419 = vst.sshfl [vmem:[#allocation5 + $0xd] sm:$0x1 pattern:$0x73625140] %v274_v54  ;;  %v365_v61 = vrot.slane %v357_v55, %v565_v2 }
 0x160   :  { %252 = vst [vmem:[#allocation5 + $0x1c] sm:$0x1] %v244_v56  ;;  %v334_v62 = vrot.slane %v320_v57, %v565_v2  ;;  %v335_v63 = vcombine.high %v327_v58, %v327_v58  ;;  %421 = vst.sshfl [vmem:[#allocation5 + $0xe] sm:$0x1 pattern:$0x73625140] %v320_v57 }
 0x161   :  { %v290_v0 = vcombine.high %v288_v59, %v288_v59  ;;  %297 = vst [vmem:[#allocation5 + $0x15] sm:$0x1] %v289_v60  ;;  %v366_v53 = vcombine.high %v365_v61, %v365_v61  ;;  %v373_v1 = vrot.slane %v365_v61, %v565_v2  ;;  %422 = vst.sshfl [vmem:[#allocation5 + $0x7] sm:$0x1 pattern:$0x73625140] %v365_v61 }
 0x162   :  { %v336_v3 = vcombine.high %v334_v62, %v334_v62  ;;  %343 = vst [vmem:[#allocation5 + $0x16] sm:$0x1] %v335_v63 }
 0x163   :  { %298 = vst [vmem:[#allocation5 + $0x1d] sm:$0x1] %v290_v0  ;;  %v380_v4 = vrot.slane %v366_v53, %v565_v2  ;;  %v381_v5 = vcombine.high %v373_v1, %v373_v1  ;;  %423 = vst.sshfl [vmem:[#allocation5 + $0xf] sm:$0x1 pattern:$0x73625140] %v366_v53 }
 0x164   :  { %344 = vst [vmem:[#allocation5 + $0x1e] sm:$0x1] %v336_v3 }
 0x165   :  { %v382_v6 = vcombine.high %v380_v4, %v380_v4  ;;  %389 = vst [vmem:[#allocation5 + $0x17] sm:$0x1] %v381_v5 }
 0x167   :  { %390 = vst [vmem:[#allocation5 + $0x1f] sm:$0x1] %v382_v6 }
 0x168   :  { %496 = shalt.err (!%p493_p12)
}
 0x169   :  { %s497_s24 = scalar_lea.hbm %s607_s1, 512 }
 0x16a   :  { %p498_p13 = scmp.ne.s32.totalorder %s607_s1, %s497_s24  ;;  %p501_p0 = scmp.lt.u32.totalorder %s497_s24, %s607_s1 }
 0x16c   :  { %p503_p1 = pnand %p501_p0, %p498_p13 }
 0x16e   :  { %506 = shalt.err (!%p503_p1)
}
 0x16f   :  { %s516_s29 = smov 128   ;;  %s517_s30 = smov 8  }
 0x170   :  { %402 = dma.vmem_to_hbm [thread:$0]  %s397_s20, 512, %s607_s1, [#allocation4], %s516_s29, %s516_s29, %s517_s30  }
 0x171   :  { %509 = dma.done.wait [#allocation4], 512  }
 0x172   :  { %510 = vsyncadd [#allocation4], 4294966784 }
 0x173   :  { %406 = vsyncpa [#allocation3], 1 }
 0x174   :  { %407 = vsyncpa [#allocation4], 1 }

</bundles_post_ra>
